<compile_context>
chip_gen: v6e
topology: v6e:2x2x1
jax: 0.10.0
libtpu: 0.0.40
codegen_flags: <defaults>
</compile_context>

<pallas_src>
import functools
import math

import jax
import jax.numpy as jnp
from jax.experimental import pallas as pl
from jax.experimental.pallas import tpu as pltpu

_MiB = 1024 * 1024


def _block_spec(shape, index_map, n_buffers=2):
    """BlockSpec with optional >2-deep pipelining, falling back gracefully."""
    if n_buffers > 2:
        try:
            return pl.BlockSpec(shape, index_map,
                                pipeline_mode=pl.Buffered(n_buffers))
        except (TypeError, AttributeError):
            pass
    return pl.BlockSpec(shape, index_map)


# ----------------------------------------------------------------------------
# Row-normalization kernel (hoisted; always used for x, used for W only when
# the batch needs many B-tiles).
# ----------------------------------------------------------------------------
def _normalize_rows_kernel(x_ref, out_ref):
    x = x_ref[...].astype(jnp.float32)                      # (tr, D)
    # F.normalize semantics: x / max(||x||, 1e-12) == x * rsqrt(max(ss, 1e-24))
    inv_norm = jax.lax.rsqrt(
        jnp.maximum(jnp.sum(x * x, axis=-1, keepdims=True), 1e-24))
    out_ref[...] = (x * inv_norm).astype(out_ref.dtype)


def _normalize_rows(x, out_dtype, *, vmem_budget_bytes=12 * _MiB):
    R, D = x.shape
    out_itemsize = jnp.dtype(out_dtype).itemsize
    # Double-buffered f32 input tile + double-buffered output tile.
    bytes_per_row = 2 * D * (4 + out_itemsize)
    max_rows = max(8, int(vmem_budget_bytes // bytes_per_row) // 8 * 8)
    tr = R if R <= max_rows else max_rows
    vmem_limit = int(min(max(int(1.5 * tr * bytes_per_row), 16 * _MiB),
                         48 * _MiB))
    return pl.pallas_call(
        _normalize_rows_kernel,
        out_shape=jax.ShapeDtypeStruct((R, D), out_dtype),
        grid=(pl.cdiv(R, tr),),
        in_specs=[pl.BlockSpec((tr, D), lambda i: (i, 0))],
        out_specs=pl.BlockSpec((tr, D), lambda i: (i, 0)),
        compiler_params=pltpu.CompilerParams(
            dimension_semantics=("parallel",),
            vmem_limit_bytes=vmem_limit),
    )(x)


# ----------------------------------------------------------------------------
# Main ArcMargin kernel: (fused W-norm) + cosine matmul + margin epilogue on
# one (tm, tn) output tile.
# ----------------------------------------------------------------------------
def _arcmargin_kernel(label_ref, xn_ref, w_ref, out_ref, *,
                      s, s_cos_m, s_sin_m, th, s_mm, easy_margin, tn,
                      fuse_w_norm, compute_dtype):
    # label_ref: (tm, 1) int32, xn_ref: (tm, D) compute_dtype,
    # w_ref: (tn, D) raw f32 (fused) or pre-normalized compute_dtype.
    if fuse_w_norm:
        w = w_ref[...].astype(jnp.float32)
        inv_norm = jax.lax.rsqrt(
            jnp.maximum(jnp.sum(w * w, axis=-1, keepdims=True), 1e-24))
        wn = (w * inv_norm).astype(compute_dtype)
    else:
        wn = w_ref[...]

    # MXU matmul contracting the last dims directly (x @ W.T), f32 accumulate.
    cosine = jax.lax.dot_general(
        xn_ref[...], wn,
        dimension_numbers=(((1,), (1,)), ((), ())),
        preferred_element_type=jnp.float32)                  # (tm, tn) f32

    sine = jnp.sqrt(jnp.clip(1.0 - cosine * cosine, 0.0, 1.0))

    # s folded into the constants: no final full-tile `* s` multiply.
    s_cosine = cosine * s
    s_phi = cosine * s_cos_m - sine * s_sin_m
    if easy_margin:
        s_phi = jnp.where(cosine > 0.0, s_phi, s_cosine)
    else:
        s_phi = jnp.where(cosine > th, s_phi, s_cosine - s_mm)

    # One-hot mask from a tiny (1, tn) iota broadcast against (tm, 1) labels,
    # with class ids offset by this C tile's base.
    j = pl.program_id(1)
    class_ids = j * tn + jax.lax.broadcasted_iota(jnp.int32, (1, tn), 1)
    mask = class_ids == label_ref[...]                       # (tm, tn) bool

    out_ref[...] = jnp.where(mask, s_phi, s_cosine).astype(out_ref.dtype)


def arc_margin_product(x, weight, label, *, s=30.0, m=0.5, easy_margin=False,
                       use_bf16_matmul=True, bm=512, bn=1024,
                       out_dtype=jnp.float32):
    """x: (B, in_features) f32, weight: (out_features, in_features) f32,
    label: (B,) int with values in [0, out_features).
    Returns (B, out_features) ArcFace logits."""
    B, D = x.shape
    C, D2 = weight.shape
    assert D == D2

    compute_dtype = jnp.bfloat16 if use_bf16_matmul else jnp.float32
    c_itemsize = jnp.dtype(compute_dtype).itemsize
    out_itemsize = jnp.dtype(out_dtype).itemsize

    # Tile sizes: full dim if small, else MXU/lane-friendly multiples.
    tm = B if B <= bm else bm                                 # bm % 8   == 0
    tn = C if C <= bn else bn                                 # bn % 128 == 0
    gB, gC = pl.cdiv(B, tm), pl.cdiv(C, tn)

    # x normalization is always hoisted (done exactly once per row, tiny).
    xn = _normalize_rows(x, compute_dtype)
    label2d = label.astype(jnp.int32).reshape(B, 1)

    # Fuse W normalization when it costs less HBM traffic than a separate pass:
    #   fused:   gB * C*D*4 bytes        hoisted: C*D*(4+2) + gB * C*D*2 bytes
    fuse_w_norm = gB <= 3
    if fuse_w_norm:
        w_in = weight.astype(jnp.float32)
        w_itemsize = 4
    else:
        w_in = _normalize_rows(weight, compute_dtype)
        w_itemsize = c_itemsize

    # W is the only large per-step DMA; deepen its pipeline on large grids.
    n_w_buffers = 3 if (gB * gC) >= 3 else 2

    kernel = functools.partial(
        _arcmargin_kernel,
        s=float(s),
        s_cos_m=float(s) * math.cos(m),
        s_sin_m=float(s) * math.sin(m),
        th=math.cos(math.pi - m),
        s_mm=float(s) * math.sin(math.pi - m) * m,
        easy_margin=easy_margin,
        tn=tn,
        fuse_w_norm=fuse_w_norm,
        compute_dtype=compute_dtype,
    )

    cost = pl.CostEstimate(
        flops=2 * B * C * D,
        transcendentals=B * C + (C if fuse_w_norm else 0),
        bytes_accessed=(B * D * c_itemsize + gB * C * D * w_itemsize
                        + B * 4 + B * C * out_itemsize),
    )

    # Explicit VMEM budget: pipelined x / W / label / out tiles + headroom,
    # capped at 48 MiB so v7x (64 MiB physical per core) keeps scratch room.
    tile_bytes = (2 * tm * D * c_itemsize            # x (double-buffered)
                  + n_w_buffers * tn * D * w_itemsize
                  + 2 * tm * 4                       # label
                  + 2 * tm * tn * out_itemsize)      # output
    vmem_limit = int(min(max(int(1.5 * tile_bytes), 16 * _MiB), 48 * _MiB))

    return pl.pallas_call(
        kernel,
        out_shape=jax.ShapeDtypeStruct((B, C), out_dtype),
        grid=(gB, gC),                                # C innermost => x/label
        in_specs=[                                    # blocks revisited, no DMA
            pl.BlockSpec((tm, 1), lambda i, j: (i, 0)),   # label
            pl.BlockSpec((tm, D), lambda i, j: (i, 0)),   # normalized x
            _block_spec((tn, D), lambda i, j: (j, 0), n_w_buffers),  # W
        ],
        out_specs=pl.BlockSpec((tm, tn), lambda i, j: (i, j)),
        compiler_params=pltpu.CompilerParams(
            # "arbitrary" on B, "parallel" on C: a v7x megacore split lands on
            # the class axis so each core streams a disjoint half of W.
            dimension_semantics=("arbitrary", "parallel"),
            vmem_limit_bytes=vmem_limit,
        ),
        cost_estimate=cost,
    )(label2d, xn, w_in)


# ----------------------------------------------------------------------------
# Reference + test harness
# ----------------------------------------------------------------------------
def _xavier_uniform(key, shape):
    fan_out, fan_in = shape
    bound = math.sqrt(6.0 / (fan_in + fan_out))
    return jax.random.uniform(key, shape, jnp.float32, -bound, bound)


def _reference(x, weight, label, *, s=30.0, m=0.5, easy_margin=False,
               compute_dtype=jnp.bfloat16):
    # Same math as the PyTorch module, with the matmul operands rounded to the
    # kernel's compute dtype so the comparison isolates kernel correctness.
    xn = (x * jax.lax.rsqrt(
        jnp.maximum(jnp.sum(x * x, -1, keepdims=True), 1e-24))).astype(compute_dtype)
    wn = (weight * jax.lax.rsqrt(
        jnp.maximum(jnp.sum(weight * weight, -1, keepdims=True), 1e-24))).astype(compute_dtype)
    cosine = jax.lax.dot_general(xn, wn, (((1,), (1,)), ((), ())),
                                 preferred_element_type=jnp.float32)
    sine = jnp.sqrt(jnp.clip(1.0 - cosine * cosine, 0.0, 1.0))
    cos_m, sin_m = math.cos(m), math.sin(m)
    th, mm = math.cos(math.pi - m), math.sin(math.pi - m) * m
    phi = cosine * cos_m - sine * sin_m
    if easy_margin:
        phi = jnp.where(cosine > 0.0, phi, cosine)
    else:
        phi = jnp.where(cosine > th, phi, cosine - mm)
    one_hot = jax.nn.one_hot(label, weight.shape[0], dtype=jnp.float32)
    return (one_hot * phi + (1.0 - one_hot) * cosine) * s


if __name__ == "__main__":
    key = jax.random.PRNGKey(0)
    k_x, k_w, k_l = jax.random.split(key, 3)

    B, in_features, out_features = 8, 32, 16
    x = jax.random.normal(k_x, (B, in_features), jnp.float32)
    weight = _xavier_uniform(k_w, (out_features, in_features))
    label = jax.random.randint(k_l, (B,), 0, out_features, jnp.int32)

    out = arc_margin_product(x, weight, label, s=30.0, m=0.5, easy_margin=False)
    out = jax.block_until_ready(out)

    ref = _reference(x, weight, label, s=30.0, m=0.5, easy_margin=False,
                     compute_dtype=jnp.bfloat16)
    assert out.shape == (B, out_features)
    assert jnp.allclose(out, ref, atol=2e-2, rtol=2e-2), "mismatch vs reference"

    print("KERNEL_OK")
</pallas_src>

<mosaic_0001>
module attributes {stable_mosaic.version = 11 : i64} {
  func.func @_normalize_rows_kernel(%arg0: i32, %arg1: memref<8x32xf32, #tpu.memory_space<vmem>>, %arg2: memref<8x32xbf16, #tpu.memory_space<vmem>>) attributes {dimension_semantics = [#tpu.dimension_semantics<parallel>], iteration_bounds = array<i64: 1>, scalar_prefetch = 0 : i64, scratch_operands = 0 : i64, tpu.core_type = #tpu.core_type<tc>, window_params = [{transform_indices = @transform_0, window_bounds = array<i64: 8, 32>}, {transform_indices = @transform_1, window_bounds = array<i64: 8, 32>}]} {
    %c0 = arith.constant 0 : index
    %c0_0 = arith.constant 0 : index
    %0 = vector.load %arg1[%c0, %c0_0] : memref<8x32xf32, #tpu.memory_space<vmem>>, vector<8x32xf32>
    %1 = arith.mulf %0, %0 : vector<8x32xf32>
    %cst = arith.constant dense<0.000000e+00> : vector<8xf32>
    %2 = vector.multi_reduction <add>, %1, %cst [1] : vector<8x32xf32> to vector<8xf32>
    %3 = vector.shape_cast %2 : vector<8xf32> to vector<8x1xf32>
    %cst_1 = arith.constant 1.000000e-24 : f32
    %4 = vector.broadcast %cst_1 : f32 to vector<8x1xf32>
    %5 = arith.maximumf %3, %4 : vector<8x1xf32>
    %6 = math.rsqrt %5 : vector<8x1xf32>
    %7 = vector.broadcast %6 : vector<8x1xf32> to vector<8x32xf32>
    %8 = arith.mulf %0, %7 : vector<8x32xf32>
    %9 = arith.truncf %8 : vector<8x32xf32> to vector<8x32xbf16>
    %c0_2 = arith.constant 0 : index
    %c0_3 = arith.constant 0 : index
    %10 = vector.load %arg2[%c0_2, %c0_3] : memref<8x32xbf16, #tpu.memory_space<vmem>>, vector<8x32xbf16>
    tpu.vector_store %arg2[%c0_2, %c0_3], %9 {strides = array<i32>} : memref<8x32xbf16, #tpu.memory_space<vmem>>, vector<8x32xbf16>,
    return
  }
  func.func @transform_0(%arg0: i32) -> (i32, i32) {
    %c0_i32 = arith.constant 0 : i32
    %c0_i32_0 = arith.constant 0 : i32
    return %arg0, %c0_i32 : i32, i32
  }
  func.func @transform_1(%arg0: i32) -> (i32, i32) {
    %c0_i32 = arith.constant 0 : i32
    %c0_i32_0 = arith.constant 0 : i32
    return %arg0, %c0_i32 : i32, i32
  }
}

</mosaic_0001>

<bundles_post_ra>
// kernel: tpu_custom_call.1
= control target key start
LH: loop header
LB: loop body
LE: loop exit
PB: predicated region body
PF: predicated region fallthrough
CT: control target
= control target key end

     0   :  { %6 = vsyncpa [#allocation3], 0  ;;  %s114_s0 = inlined_call_operand.hbm [shape: f32[8,32], index: 0, kind: input, shape index: {}]   ;;  %s115_s1 = inlined_call_operand.hbm [shape: bf16[8,32], index: 1, kind: output, shape index: {}]  }
   0x1   :  { %7 = vsyncpa [#allocation4], 0  ;;  %s96_s6 = smov [#allocation2]  }
   0x2   :  { %s14_s7 = sshll.u32 %s96_s6, 4  ;;  %s15_s7 = int_to_ptr.vmem [resolvable:$true] %s14_s7 }
   0x3   :  { %s60_s8 = scalar_lea.vmem %s15_s7, 128  ;;  %p65_p1 = scmp.lt.s32.totalorder %s15_s7, %s15_s7 }
   0x4   :  { %p61_p0 = scmp.ne.s32.totalorder %s15_s7, %s60_s8  ;;  %p66_p2 = scmp.lt.s32.totalorder %s60_s8, %s60_s8 }
   0x6   :  { %p67_p3 = por %p66_p2, %p65_p1 }
   0x8   :  { %p68_p4 = pnand %p67_p3, %p61_p0 }
   0xa   :  { %71 = shalt.err (!%p68_p4)
}
   0xb   :  { %17 = dma.hbm_to_vmem [thread:$0]  %s114_s0, 128, %s15_s7, [#allocation3]  }
   0xc   :  { %92 = dma.done.wait [#allocation3], 128  }
   0xd   :  { %93 = vsyncadd [#allocation3], 4294967168  ;;  %v21_v0 = vld [vmem:[#allocation2] sm:$0xff]  ;;  %vm23_vm0 = vcmask 261120   ;;  %s97_s11 = smov [#allocation5]   ;;  %vm31_vm1 = vcmask 257024  }
   0xe   :  { %v22_v1 = vmul.f32 %v21_v0, %v21_v0  ;;  %s39_s12 = sshll.u32 %s97_s11, 4  ;;  %s40_s12 = int_to_ptr.vmem [resolvable:$true] %s39_s12 }
   0xf   :  { %s72_s13 = scalar_lea.vmem %s40_s12, 64  ;;  %p77_p6 = scmp.lt.s32.totalorder %s40_s12, %s40_s12 }
  0x10   :  { %v24_v2 = vsel %vm23_vm0, %v22_v1, 0.0  ;;  %p73_p5 = scmp.ne.s32.totalorder %s40_s12, %s72_s13  ;;  %p78_p7 = scmp.lt.s32.totalorder %s72_s13, %s72_s13 }
  0x11   :  { %25 = vadd.xlane.f32.xlu0 %v24_v2 }
  0x12   :  { %p79_p8 = por %p78_p7, %p77_p6 }
  0x14   :  { %p80_p9 = pnand %p79_p8, %p73_p5 }
  0x9a   :  { %v26_v3 = vpop.xlane.xlu0 %25 }
  0x9b   :  { %v27_v4 = vmax.f32 %v26_v3, 1e-24 }
  0x9d   :  { %50 = vrsqrt.f32 %v27_v4 }
  0xaa   :  { %v51_v5 = vpop.eup %50 }
  0xab   :  { %v29_v6 = vmul.f32 %v51_v5, %v21_v0 }
  0xad   :  { %v30_v7 = vpack.c.bf16 %v29_v6, %v29_v6 }
  0xaf   :  { %32 = vst.msk [vmem:[#allocation5] sm:$0xf] %vm31_vm1, %v30_v7 }
  0xb0   :  { %83 = shalt.err (!%p80_p9)
}
  0xb1   :  { %42 = dma.vmem_to_hbm [thread:$0]  %s40_s12, 64, %s115_s1, [#allocation4]  }
  0xb2   :  { %94 = dma.done.wait [#allocation4], 64  }
  0xb3   :  { %95 = vsyncadd [#allocation4], 4294967232 }
  0xb4   :  { %46 = vsyncpa [#allocation3], 1 }
  0xb5   :  { %47 = vsyncpa [#allocation4], 1 }

</bundles_post_ra>
